<compile_context>
chip_gen: v6e
topology: v6e:2x2x1
jax: 0.10.0
libtpu: 0.0.40
codegen_flags: <defaults>
</compile_context>

<pallas_src>
import functools

import jax
import jax.numpy as jnp
from jax import lax
from jax.experimental import pallas as pl
from jax.experimental.pallas import tpu as pltpu


def _round8(n):
    return ((n + 7) // 8) * 8


def _round128(n):
    return ((n + 127) // 128) * 128


def _lstm_residual_kernel(x_ref, wlstm_ref, whead_hbm, out_ref,
                          whead_vmem, head_sem, *, H, O):
    """Fused LSTM recurrence + residual-concat linear head.

    x_ref      : (S, I)            input sequence (VMEM)
    wlstm_ref  : (R1, Gpad) VMEM   packed [W_ih^T | bias row | W_hh^T],
                                   g-gate columns pre-scaled by 2
    whead_hbm  : (R2, Opad) ANY    packed [W_lin[:, :H]^T | W_lin[:, H:]^T | bias row]
    out_ref    : (S, O)            predictions
    whead_vmem : (R2, Opad) VMEM   scratch landing buffer for the head slab
    head_sem   : DMA semaphore
    """
    # Kick off the head-weight DMA immediately; it overlaps the serial
    # recurrence and is only waited on right before the head matmuls.
    head_cp = pltpu.make_async_copy(whead_hbm, whead_vmem, head_sem)
    head_cp.start()

    S, I = x_ref.shape
    G = 4 * H

    # Static, 8-aligned row offsets inside the packed LSTM slab.
    r_b = _round8(I)
    r_whh = r_b + 8

    x = x_ref[...]
    wih = wlstm_ref[0:I, 0:G]                 # (I, 4H)  g-cols pre-scaled x2
    brow = wlstm_ref[r_b:r_b + 1, 0:G]        # (1, 4H)  (b_ih + b_hh), pre-scaled
    whh = wlstm_ref[r_whh:r_whh + H, 0:G]     # (H, 4H)  pre-scaled

    # Hot path 1: input projection for ALL timesteps in one MXU matmul,
    # bias folded in.  Kept as a value (one vreg) and indexed statically
    # inside the unrolled loop -> no per-step VMEM traffic.
    xproj = jnp.dot(x, wih, preferred_element_type=jnp.float32) + brow   # (S, 4H)

    # ---- loop-invariant constants (hoisted; JAX does not CSE broadcasts) ----
    # One full-width sigmoid per step produces all four gates:
    #   i, f, o lanes: sigmoid(g)     g lanes: tanh(g) = 2*sigmoid(2g) - 1
    # (the x2 pre-scale of the g lanes is already baked into the weights).
    lane = lax.broadcasted_iota(jnp.int32, (1, G), 1)
    is_g = jnp.logical_and(lane >= 2 * H, lane < 3 * H)
    gate_scale = jnp.where(is_g, 2.0, 1.0).astype(jnp.float32)
    gate_shift = jnp.where(is_g, -1.0, 0.0).astype(jnp.float32)

    # HxH identity: moves h from lanes to sublanes with a masked lane reduce
    # (VPU + XLU only; no per-step MXU push/pop on the serial critical path).
    rid = lax.broadcasted_iota(jnp.int32, (H, H), 0)
    cid = lax.broadcasted_iota(jnp.int32, (H, H), 1)
    eye_h = jnp.where(rid == cid, 1.0, 0.0).astype(jnp.float32)          # (H, H)

    # SxS identity: hoisted one-hot columns used to drop each h_t into the
    # register-resident hidden-state slab (off the serial critical path).
    srow = lax.broadcasted_iota(jnp.int32, (S, S), 0)
    scol = lax.broadcasted_iota(jnp.int32, (S, S), 1)
    eye_s = jnp.where(srow == scol, 1.0, 0.0).astype(jnp.float32)        # (S, S)

    h = None
    c = None
    hs_all = jnp.zeros((S, H), jnp.float32)

    # Fully-unrolled recurrence: S is a static Python int, so every slice is
    # static and the whole dependence chain stays in vregs.
    for t in range(S):
        if t == 0:
            gates = xproj[0:1, :]                                   # h0 = 0
        else:
            # h (1,H) [lanes] -> (H,1) [sublanes] via masked lane-reduce,
            # then the recurrent projection as broadcast-mul + sublane-reduce.
            h_col = jnp.sum(eye_h * h, axis=1, keepdims=True)       # (H, 1)
            hproj = jnp.sum(h_col * whh, axis=0, keepdims=True)     # (1, 4H)
            gates = xproj[t:t + 1, :] + hproj

        # Single EUP push for all four gates, then one VPU blend turns the
        # g-gate lanes into tanh.
        acts = jax.nn.sigmoid(gates) * gate_scale + gate_shift
        i_g = acts[:, 0:H]
        f_g = acts[:, H:2 * H]
        g_g = acts[:, 2 * H:3 * H]
        o_g = acts[:, 3 * H:4 * H]

        c = i_g * g_g if t == 0 else f_g * c + i_g * g_g            # c0 = 0
        h = o_g * jnp.tanh(c)

        # Hoisted one-hot column scatter (off the serial critical path).
        hs_all = hs_all + eye_s[:, t:t + 1] * h

    # Head weights must have landed by now (DMA overlapped the recurrence).
    head_cp.wait()
    r_wlx = _round8(H)
    r_bl = r_wlx + _round8(I)
    wlh = whead_vmem[0:H, :]                  # (H, Opad)
    wlx = whead_vmem[r_wlx:r_wlx + I, :]      # (I, Opad)
    bl = whead_vmem[r_bl:r_bl + 1, :]         # (1, Opad)

    # Hot path 2: residual-concat linear head as two MXU matmuls.
    #   concat([h, x], 1) @ W_lin^T + b == h @ W[:, :H]^T + x @ W[:, H:]^T + b
    out_full = (jnp.dot(hs_all, wlh, preferred_element_type=jnp.float32)
                + jnp.dot(x, wlx, preferred_element_type=jnp.float32)
                + bl)                                               # (S, Opad)
    out_ref[...] = out_full[:, 0:O].astype(out_ref.dtype)


def residual_lstm_forward(x, params):
    """x: (seq_len, input_size) float32 -> (seq_len, output_size) float32."""
    seq, inp = x.shape
    lstm_slab = params["lstm_slab"]
    head_slab = params["head_slab"]
    H = params["hidden_size"]
    O = params["output_size"]

    kernel = functools.partial(_lstm_residual_kernel, H=H, O=O)

    return pl.pallas_call(
        kernel,
        out_shape=jax.ShapeDtypeStruct((seq, O), jnp.float32),
        grid=(1,),
        in_specs=[
            pl.BlockSpec((seq, inp), lambda i: (0, 0)),
            pl.BlockSpec(lstm_slab.shape, lambda i: (0, 0)),
            pl.BlockSpec(memory_space=pl.ANY),    # head slab: manual overlapped DMA
        ],
        out_specs=pl.BlockSpec((seq, O), lambda i: (0, 0)),
        scratch_shapes=[
            pltpu.VMEM(head_slab.shape, jnp.float32),
            pltpu.SemaphoreType.DMA,
        ],
        compiler_params=pltpu.CompilerParams(
            dimension_semantics=("arbitrary",)),
    )(x, lstm_slab, head_slab)


def make_params(key, input_size, hidden_size, output_size):
    """Deterministic synthetic parameters matching nn.LSTM / nn.Linear shapes,
    packed ONCE into two weight slabs (no per-call padding/transpose ops).

    PyTorch stores:
      lstm.weight_ih_l0 : (4H, I)   lstm.weight_hh_l0 : (4H, H)
      lstm.bias_ih_l0   : (4H,)     lstm.bias_hh_l0   : (4H,)
      linear.weight     : (O, H+I)  linear.bias       : (O,)
    """
    ks = jax.random.split(key, 6)
    H, I, O = hidden_size, input_size, output_size
    G = 4 * H
    klstm = 1.0 / jnp.sqrt(jnp.float32(H))
    klin = 1.0 / jnp.sqrt(jnp.float32(H + I))
    u = lambda k, shape, s: jax.random.uniform(k, shape, jnp.float32, -s, s)

    w_ih = u(ks[0], (G, I), klstm)
    w_hh = u(ks[1], (G, H), klstm)
    b_ih = u(ks[2], (G,), klstm)
    b_hh = u(ks[3], (G,), klstm)
    w_lin = u(ks[4], (O, H + I), klin)
    b_lin = u(ks[5], (O,), klin)

    # g-gate (tanh) columns pre-scaled by 2 so the kernel only needs the
    # post-sigmoid blend tanh(x) = 2*sigmoid(2x) - 1.
    col = jnp.arange(G)
    gsc = jnp.where((col >= 2 * H) & (col < 3 * H), 2.0, 1.0).astype(jnp.float32)

    Gpad = _round128(G)
    Opad = _round128(O)

    # LSTM slab: [ W_ih^T (I rows) | bias row (8-row section) | W_hh^T (H rows) ]
    r_b = _round8(I)
    r_whh = r_b + 8
    lstm_rows = r_whh + _round8(H)
    lstm_slab = jnp.zeros((lstm_rows, Gpad), jnp.float32)
    lstm_slab = lstm_slab.at[0:I, 0:G].set(w_ih.T * gsc)
    lstm_slab = lstm_slab.at[r_b, 0:G].set((b_ih + b_hh) * gsc)
    lstm_slab = lstm_slab.at[r_whh:r_whh + H, 0:G].set(w_hh.T * gsc)

    # Head slab: [ W_lin[:, :H]^T (H rows) | W_lin[:, H:]^T (I rows) | bias row ]
    r_wlx = _round8(H)
    r_bl = r_wlx + _round8(I)
    head_rows = r_bl + 8
    head_slab = jnp.zeros((head_rows, Opad), jnp.float32)
    head_slab = head_slab.at[0:H, 0:O].set(w_lin[:, :H].T)
    head_slab = head_slab.at[r_wlx:r_wlx + I, 0:O].set(w_lin[:, H:].T)
    head_slab = head_slab.at[r_bl, 0:O].set(b_lin)

    return {
        "hidden_size": H,
        "output_size": O,
        "lstm_slab": lstm_slab,
        "head_slab": head_slab,
        # raw forms for the pure-JAX reference
        "_raw": (w_ih, w_hh, b_ih, b_hh, w_lin, b_lin),
    }


def reference_forward(x, params):
    """Pure-JAX reference matching PyTorch LSTM (gate order i, f, g, o)."""
    w_ih, w_hh, b_ih, b_hh, w_lin, b_lin = params["_raw"]
    H = w_hh.shape[1]

    def step(carry, x_t):
        h, c = carry
        gates = x_t @ w_ih.T + b_ih + h @ w_hh.T + b_hh
        i_g = jax.nn.sigmoid(gates[:, 0:H])
        f_g = jax.nn.sigmoid(gates[:, H:2 * H])
        g_g = jnp.tanh(gates[:, 2 * H:3 * H])
        o_g = jax.nn.sigmoid(gates[:, 3 * H:4 * H])
        c = f_g * c + i_g * g_g
        h = o_g * jnp.tanh(c)
        return (h, c), h

    h0 = jnp.zeros((1, H), jnp.float32)
    c0 = jnp.zeros((1, H), jnp.float32)
    _, hs = lax.scan(step, (h0, c0), x[:, None, :])
    hs = hs[:, 0, :]
    combined = jnp.concatenate([hs, x], axis=1)
    return combined @ w_lin.T + b_lin


if __name__ == "__main__":
    seq_len = 8
    input_size = 16
    hidden_size = 32
    output_size = 8

    key = jax.random.PRNGKey(0)
    kx, kp = jax.random.split(key)
    x = jax.random.normal(kx, (seq_len, input_size), jnp.float32)
    params = make_params(kp, input_size, hidden_size, output_size)

    out = residual_lstm_forward(x, params)
    out = jax.block_until_ready(out)

    ref = reference_forward(x, params)
    assert out.shape == (seq_len, output_size)
    assert jnp.allclose(out, ref, atol=1e-5, rtol=1e-5), "mismatch vs reference"

    print("KERNEL_OK")
</pallas_src>

<mosaic_0001>
module attributes {stable_mosaic.version = 11 : i64} {
  func.func @_lstm_residual_kernel(%arg0: i32, %arg1: memref<8x16xf32, #tpu.memory_space<vmem>>, %arg2: memref<56x128xf32, #tpu.memory_space<vmem>>, %arg3: memref<56x128xf32, #tpu.memory_space<any>>, %arg4: memref<8x8xf32, #tpu.memory_space<vmem>>, %arg5: memref<56x128xf32, #tpu.memory_space<vmem>>, %arg6: memref<!tpu.dma_semaphore, #tpu.memory_space<semaphore_mem>>) attributes {dimension_semantics = [#tpu.dimension_semantics<arbitrary>], iteration_bounds = array<i64: 1>, scalar_prefetch = 0 : i64, scratch_operands = 2 : i64, tpu.core_type = #tpu.core_type<tc>, window_params = [{pipeline_mode = #tpu.pipeline_mode<synchronous>, transform_indices = @transform_0, window_bounds = array<i64: 8, 16>}, {pipeline_mode = #tpu.pipeline_mode<synchronous>, transform_indices = @transform_1, window_bounds = array<i64: 56, 128>}, {}, {pipeline_mode = #tpu.pipeline_mode<synchronous>, transform_indices = @transform_3, window_bounds = array<i64: 8, 8>}]} {
    tpu.enqueue_dma source(%arg3 : memref<56x128xf32, #tpu.memory_space<any>>) target(%arg5 : memref<56x128xf32, #tpu.memory_space<vmem>>) target_semaphore(%arg6 : memref<!tpu.dma_semaphore, #tpu.memory_space<semaphore_mem>>)
    %c0 = arith.constant 0 : index
    %c0_0 = arith.constant 0 : index
    %0 = vector.load %arg1[%c0, %c0_0] : memref<8x16xf32, #tpu.memory_space<vmem>>, vector<8x16xf32>
    %c0_1 = arith.constant 0 : index
    %c0_2 = arith.constant 0 : index
    %1 = vector.load %arg2[%c0_1, %c0_2] : memref<56x128xf32, #tpu.memory_space<vmem>>, vector<16x128xf32>
    %c16 = arith.constant 16 : index
    %c0_3 = arith.constant 0 : index
    %2 = vector.load %arg2[%c16, %c0_3] : memref<56x128xf32, #tpu.memory_space<vmem>>, vector<1x128xf32>
    %c24 = arith.constant 24 : index
    %c0_4 = arith.constant 0 : index
    %3 = vector.load %arg2[%c24, %c0_4] : memref<56x128xf32, #tpu.memory_space<vmem>>, vector<32x128xf32>
    %cst = arith.constant dense<0.000000e+00> : vector<8x128xf32>
    %4 = tpu.matmul %0, %1, %cst {dimension_numbers = #tpu.dot_dimension_numbers<[1], [0], [0], [1], [0, 0, 1, 1], [], []>} : vector<8x16xf32>, vector<16x128xf32>, vector<8x128xf32> -> vector<8x128xf32>
    %5 = vector.broadcast %2 : vector<1x128xf32> to vector<8x128xf32>
    %6 = arith.addf %4, %5 : vector<8x128xf32>
    %7 = tpu.iota {dimensions = array<i32: 1>} : vector<1x128xi32>
    %c64_i32 = arith.constant 64 : i32
    %8 = vector.broadcast %c64_i32 : i32 to vector<1x128xi32>
    %9 = arith.cmpi sge, %7, %8 : vector<1x128xi32>
    %c96_i32 = arith.constant 96 : i32
    %10 = vector.broadcast %c96_i32 : i32 to vector<1x128xi32>
    %11 = arith.cmpi slt, %7, %10 : vector<1x128xi32>
    %12 = arith.andi %9, %11 : vector<1x128xi1>
    %cst_5 = arith.constant 2.000000e+00 : f32
    %cst_6 = arith.constant 1.000000e+00 : f32
    %13 = vector.broadcast %cst_5 : f32 to vector<1x128xf32>
    %14 = vector.broadcast %cst_6 : f32 to vector<1x128xf32>
    %15 = arith.select %12, %13, %14 : vector<1x128xi1>, vector<1x128xf32>
    %cst_7 = arith.constant -1.000000e+00 : f32
    %cst_8 = arith.constant 0.000000e+00 : f32
    %16 = vector.broadcast %cst_7 : f32 to vector<1x128xf32>
    %17 = vector.broadcast %cst_8 : f32 to vector<1x128xf32>
    %18 = arith.select %12, %16, %17 : vector<1x128xi1>, vector<1x128xf32>
    %19 = tpu.iota {dimensions = array<i32: 0>} : vector<32x32xi32>
    %20 = tpu.iota {dimensions = array<i32: 1>} : vector<32x32xi32>
    %21 = arith.cmpi eq, %19, %20 : vector<32x32xi32>
    %cst_9 = arith.constant 1.000000e+00 : f32
    %cst_10 = arith.constant 0.000000e+00 : f32
    %22 = vector.broadcast %cst_9 : f32 to vector<32x32xf32>
    %23 = vector.broadcast %cst_10 : f32 to vector<32x32xf32>
    %24 = arith.select %21, %22, %23 : vector<32x32xi1>, vector<32x32xf32>
    %25 = tpu.iota {dimensions = array<i32: 0>} : vector<8x8xi32>
    %26 = tpu.iota {dimensions = array<i32: 1>} : vector<8x8xi32>
    %27 = arith.cmpi eq, %25, %26 : vector<8x8xi32>
    %cst_11 = arith.constant 1.000000e+00 : f32
    %cst_12 = arith.constant 0.000000e+00 : f32
    %28 = vector.broadcast %cst_11 : f32 to vector<8x8xf32>
    %29 = vector.broadcast %cst_12 : f32 to vector<8x8xf32>
    %30 = arith.select %27, %28, %29 : vector<8x8xi1>, vector<8x8xf32>
    %cst_13 = arith.constant 0.000000e+00 : f32
    %31 = vector.broadcast %cst_13 : f32 to vector<8x32xf32>
    %32 = vector.extract_strided_slice %6 {offsets = [0, 0], sizes = [1, 128], strides = [1, 1]} : vector<8x128xf32> to vector<1x128xf32>
    %33 = arith.negf %32 : vector<1x128xf32>
    %34 = math.exp %33 : vector<1x128xf32>
    %cst_14 = arith.constant 1.000000e+00 : f32
    %35 = vector.broadcast %cst_14 : f32 to vector<1x128xf32>
    %36 = arith.addf %35, %34 : vector<1x128xf32>
    %37 = arith.divf %35, %36 : vector<1x128xf32>
    %38 = arith.mulf %37, %15 : vector<1x128xf32>
    %39 = arith.addf %38, %18 : vector<1x128xf32>
    %40 = vector.extract_strided_slice %39 {offsets = [0, 0], sizes = [1, 32], strides = [1, 1]} : vector<1x128xf32> to vector<1x32xf32>
    %41 = vector.extract_strided_slice %39 {offsets = [0, 64], sizes = [1, 32], strides = [1, 1]} : vector<1x128xf32> to vector<1x32xf32>
    %42 = vector.extract_strided_slice %39 {offsets = [0, 96], sizes = [1, 32], strides = [1, 1]} : vector<1x128xf32> to vector<1x32xf32>
    %43 = arith.mulf %40, %41 : vector<1x32xf32>
    %44 = math.tanh %43 : vector<1x32xf32>
    %45 = arith.mulf %42, %44 : vector<1x32xf32>
    %46 = vector.extract_strided_slice %30 {offsets = [0, 0], sizes = [8, 1], strides = [1, 1]} : vector<8x8xf32> to vector<8x1xf32>
    %47 = vector.broadcast %46 : vector<8x1xf32> to vector<8x32xf32>
    %48 = vector.broadcast %45 : vector<1x32xf32> to vector<8x32xf32>
    %49 = arith.mulf %47, %48 : vector<8x32xf32>
    %50 = arith.addf %31, %49 : vector<8x32xf32>
    %51 = vector.broadcast %45 : vector<1x32xf32> to vector<32x32xf32>
    %52 = arith.mulf %24, %51 : vector<32x32xf32>
    %cst_15 = arith.constant dense<0.000000e+00> : vector<32xf32>
    %53 = vector.multi_reduction <add>, %52, %cst_15 [1] : vector<32x32xf32> to vector<32xf32>
    %54 = vector.shape_cast %53 : vector<32xf32> to vector<32x1xf32>
    %55 = vector.broadcast %54 : vector<32x1xf32> to vector<32x128xf32>
    %56 = arith.mulf %55, %3 : vector<32x128xf32>
    %cst_16 = arith.constant dense<0.000000e+00> : vector<128xf32>
    %57 = vector.multi_reduction <add>, %56, %cst_16 [0] : vector<32x128xf32> to vector<128xf32>
    %58 = vector.shape_cast %57 : vector<128xf32> to vector<1x128xf32>
    %59 = vector.extract_strided_slice %6 {offsets = [1, 0], sizes = [1, 128], strides = [1, 1]} : vector<8x128xf32> to vector<1x128xf32>
    %60 = arith.addf %59, %58 : vector<1x128xf32>
    %61 = arith.negf %60 : vector<1x128xf32>
    %62 = math.exp %61 : vector<1x128xf32>
    %cst_17 = arith.constant 1.000000e+00 : f32
    %63 = vector.broadcast %cst_17 : f32 to vector<1x128xf32>
    %64 = arith.addf %63, %62 : vector<1x128xf32>
    %65 = arith.divf %63, %64 : vector<1x128xf32>
    %66 = arith.mulf %65, %15 : vector<1x128xf32>
    %67 = arith.addf %66, %18 : vector<1x128xf32>
    %68 = vector.extract_strided_slice %67 {offsets = [0, 0], sizes = [1, 32], strides = [1, 1]} : vector<1x128xf32> to vector<1x32xf32>
    %69 = vector.extract_strided_slice %67 {offsets = [0, 32], sizes = [1, 32], strides = [1, 1]} : vector<1x128xf32> to vector<1x32xf32>
    %70 = vector.extract_strided_slice %67 {offsets = [0, 64], sizes = [1, 32], strides = [1, 1]} : vector<1x128xf32> to vector<1x32xf32>
    %71 = vector.extract_strided_slice %67 {offsets = [0, 96], sizes = [1, 32], strides = [1, 1]} : vector<1x128xf32> to vector<1x32xf32>
    %72 = arith.mulf %69, %43 : vector<1x32xf32>
    %73 = arith.mulf %68, %70 : vector<1x32xf32>
    %74 = arith.addf %72, %73 : vector<1x32xf32>
    %75 = math.tanh %74 : vector<1x32xf32>
    %76 = arith.mulf %71, %75 : vector<1x32xf32>
    %77 = vector.extract_strided_slice %30 {offsets = [0, 1], sizes = [8, 1], strides = [1, 1]} : vector<8x8xf32> to vector<8x1xf32>
    %78 = vector.broadcast %77 : vector<8x1xf32> to vector<8x32xf32>
    %79 = vector.broadcast %76 : vector<1x32xf32> to vector<8x32xf32>
    %80 = arith.mulf %78, %79 : vector<8x32xf32>
    %81 = arith.addf %50, %80 : vector<8x32xf32>
    %82 = vector.broadcast %76 : vector<1x32xf32> to vector<32x32xf32>
    %83 = arith.mulf %24, %82 : vector<32x32xf32>
    %cst_18 = arith.constant dense<0.000000e+00> : vector<32xf32>
    %84 = vector.multi_reduction <add>, %83, %cst_18 [1] : vector<32x32xf32> to vector<32xf32>
    %85 = vector.shape_cast %84 : vector<32xf32> to vector<32x1xf32>
    %86 = vector.broadcast %85 : vector<32x1xf32> to vector<32x128xf32>
    %87 = arith.mulf %86, %3 : vector<32x128xf32>
    %cst_19 = arith.constant dense<0.000000e+00> : vector<128xf32>
    %88 = vector.multi_reduction <add>, %87, %cst_19 [0] : vector<32x128xf32> to vector<128xf32>
    %89 = vector.shape_cast %88 : vector<128xf32> to vector<1x128xf32>
    %90 = vector.extract_strided_slice %6 {offsets = [2, 0], sizes = [1, 128], strides = [1, 1]} : vector<8x128xf32> to vector<1x128xf32>
    %91 = arith.addf %90, %89 : vector<1x128xf32>
    %92 = arith.negf %91 : vector<1x128xf32>
    %93 = math.exp %92 : vector<1x128xf32>
    %cst_20 = arith.constant 1.000000e+00 : f32
    %94 = vector.broadcast %cst_20 : f32 to vector<1x128xf32>
    %95 = arith.addf %94, %93 : vector<1x128xf32>
    %96 = arith.divf %94, %95 : vector<1x128xf32>
    %97 = arith.mulf %96, %15 : vector<1x128xf32>
    %98 = arith.addf %97, %18 : vector<1x128xf32>
    %99 = vector.extract_strided_slice %98 {offsets = [0, 0], sizes = [1, 32], strides = [1, 1]} : vector<1x128xf32> to vector<1x32xf32>
    %100 = vector.extract_strided_slice %98 {offsets = [0, 32], sizes = [1, 32], strides = [1, 1]} : vector<1x128xf32> to vector<1x32xf32>
    %101 = vector.extract_strided_slice %98 {offsets = [0, 64], sizes = [1, 32], strides = [1, 1]} : vector<1x128xf32> to vector<1x32xf32>
    %102 = vector.extract_strided_slice %98 {offsets = [0, 96], sizes = [1, 32], strides = [1, 1]} : vector<1x128xf32> to vector<1x32xf32>
    %103 = arith.mulf %100, %74 : vector<1x32xf32>
    %104 = arith.mulf %99, %101 : vector<1x32xf32>
    %105 = arith.addf %103, %104 : vector<1x32xf32>
    %106 = math.tanh %105 : vector<1x32xf32>
    %107 = arith.mulf %102, %106 : vector<1x32xf32>
    %108 = vector.extract_strided_slice %30 {offsets = [0, 2], sizes = [8, 1], strides = [1, 1]} : vector<8x8xf32> to vector<8x1xf32>
    %109 = vector.broadcast %108 : vector<8x1xf32> to vector<8x32xf32>
    %110 = vector.broadcast %107 : vector<1x32xf32> to vector<8x32xf32>
    %111 = arith.mulf %109, %110 : vector<8x32xf32>
    %112 = arith.addf %81, %111 : vector<8x32xf32>
    %113 = vector.broadcast %107 : vector<1x32xf32> to vector<32x32xf32>
    %114 = arith.mulf %24, %113 : vector<32x32xf32>
    %cst_21 = arith.constant dense<0.000000e+00> : vector<32xf32>
    %115 = vector.multi_reduction <add>, %114, %cst_21 [1] : vector<32x32xf32> to vector<32xf32>
    %116 = vector.shape_cast %115 : vector<32xf32> to vector<32x1xf32>
    %117 = vector.broadcast %116 : vector<32x1xf32> to vector<32x128xf32>
    %118 = arith.mulf %117, %3 : vector<32x128xf32>
    %cst_22 = arith.constant dense<0.000000e+00> : vector<128xf32>
    %119 = vector.multi_reduction <add>, %118, %cst_22 [0] : vector<32x128xf32> to vector<128xf32>
    %120 = vector.shape_cast %119 : vector<128xf32> to vector<1x128xf32>
    %121 = vector.extract_strided_slice %6 {offsets = [3, 0], sizes = [1, 128], strides = [1, 1]} : vector<8x128xf32> to vector<1x128xf32>
    %122 = arith.addf %121, %120 : vector<1x128xf32>
    %123 = arith.negf %122 : vector<1x128xf32>
    %124 = math.exp %123 : vector<1x128xf32>
    %cst_23 = arith.constant 1.000000e+00 : f32
    %125 = vector.broadcast %cst_23 : f32 to vector<1x128xf32>
    %126 = arith.addf %125, %124 : vector<1x128xf32>
    %127 = arith.divf %125, %126 : vector<1x128xf32>
    %128 = arith.mulf %127, %15 : vector<1x128xf32>
    %129 = arith.addf %128, %18 : vector<1x128xf32>
    %130 = vector.extract_strided_slice %129 {offsets = [0, 0], sizes = [1, 32], strides = [1, 1]} : vector<1x128xf32> to vector<1x32xf32>
    %131 = vector.extract_strided_slice %129 {offsets = [0, 32], sizes = [1, 32], strides = [1, 1]} : vector<1x128xf32> to vector<1x32xf32>
    %132 = vector.extract_strided_slice %129 {offsets = [0, 64], sizes = [1, 32], strides = [1, 1]} : vector<1x128xf32> to vector<1x32xf32>
    %133 = vector.extract_strided_slice %129 {offsets = [0, 96], sizes = [1, 32], strides = [1, 1]} : vector<1x128xf32> to vector<1x32xf32>
    %134 = arith.mulf %131, %105 : vector<1x32xf32>
    %135 = arith.mulf %130, %132 : vector<1x32xf32>
    %136 = arith.addf %134, %135 : vector<1x32xf32>
    %137 = math.tanh %136 : vector<1x32xf32>
    %138 = arith.mulf %133, %137 : vector<1x32xf32>
    %139 = vector.extract_strided_slice %30 {offsets = [0, 3], sizes = [8, 1], strides = [1, 1]} : vector<8x8xf32> to vector<8x1xf32>
    %140 = vector.broadcast %139 : vector<8x1xf32> to vector<8x32xf32>
    %141 = vector.broadcast %138 : vector<1x32xf32> to vector<8x32xf32>
    %142 = arith.mulf %140, %141 : vector<8x32xf32>
    %143 = arith.addf %112, %142 : vector<8x32xf32>
    %144 = vector.broadcast %138 : vector<1x32xf32> to vector<32x32xf32>
    %145 = arith.mulf %24, %144 : vector<32x32xf32>
    %cst_24 = arith.constant dense<0.000000e+00> : vector<32xf32>
    %146 = vector.multi_reduction <add>, %145, %cst_24 [1] : vector<32x32xf32> to vector<32xf32>
    %147 = vector.shape_cast %146 : vector<32xf32> to vector<32x1xf32>
    %148 = vector.broadcast %147 : vector<32x1xf32> to vector<32x128xf32>
    %149 = arith.mulf %148, %3 : vector<32x128xf32>
    %cst_25 = arith.constant dense<0.000000e+00> : vector<128xf32>
    %150 = vector.multi_reduction <add>, %149, %cst_25 [0] : vector<32x128xf32> to vector<128xf32>
    %151 = vector.shape_cast %150 : vector<128xf32> to vector<1x128xf32>
    %152 = vector.extract_strided_slice %6 {offsets = [4, 0], sizes = [1, 128], strides = [1, 1]} : vector<8x128xf32> to vector<1x128xf32>
    %153 = arith.addf %152, %151 : vector<1x128xf32>
    %154 = arith.negf %153 : vector<1x128xf32>
    %155 = math.exp %154 : vector<1x128xf32>
    %cst_26 = arith.constant 1.000000e+00 : f32
    %156 = vector.broadcast %cst_26 : f32 to vector<1x128xf32>
    %157 = arith.addf %156, %155 : vector<1x128xf32>
    %158 = arith.divf %156, %157 : vector<1x128xf32>
    %159 = arith.mulf %158, %15 : vector<1x128xf32>
    %160 = arith.addf %159, %18 : vector<1x128xf32>
    %161 = vector.extract_strided_slice %160 {offsets = [0, 0], sizes = [1, 32], strides = [1, 1]} : vector<1x128xf32> to vector<1x32xf32>
    %162 = vector.extract_strided_slice %160 {offsets = [0, 32], sizes = [1, 32], strides = [1, 1]} : vector<1x128xf32> to vector<1x32xf32>
    %163 = vector.extract_strided_slice %160 {offsets = [0, 64], sizes = [1, 32], strides = [1, 1]} : vector<1x128xf32> to vector<1x32xf32>
    %164 = vector.extract_strided_slice %160 {offsets = [0, 96], sizes = [1, 32], strides = [1, 1]} : vector<1x128xf32> to vector<1x32xf32>
    %165 = arith.mulf %162, %136 : vector<1x32xf32>
    %166 = arith.mulf %161, %163 : vector<1x32xf32>
    %167 = arith.addf %165, %166 : vector<1x32xf32>
    %168 = math.tanh %167 : vector<1x32xf32>
    %169 = arith.mulf %164, %168 : vector<1x32xf32>
    %170 = vector.extract_strided_slice %30 {offsets = [0, 4], sizes = [8, 1], strides = [1, 1]} : vector<8x8xf32> to vector<8x1xf32>
    %171 = vector.broadcast %170 : vector<8x1xf32> to vector<8x32xf32>
    %172 = vector.broadcast %169 : vector<1x32xf32> to vector<8x32xf32>
    %173 = arith.mulf %171, %172 : vector<8x32xf32>
    %174 = arith.addf %143, %173 : vector<8x32xf32>
    %175 = vector.broadcast %169 : vector<1x32xf32> to vector<32x32xf32>
    %176 = arith.mulf %24, %175 : vector<32x32xf32>
    %cst_27 = arith.constant dense<0.000000e+00> : vector<32xf32>
    %177 = vector.multi_reduction <add>, %176, %cst_27 [1] : vector<32x32xf32> to vector<32xf32>
    %178 = vector.shape_cast %177 : vector<32xf32> to vector<32x1xf32>
    %179 = vector.broadcast %178 : vector<32x1xf32> to vector<32x128xf32>
    %180 = arith.mulf %179, %3 : vector<32x128xf32>
    %cst_28 = arith.constant dense<0.000000e+00> : vector<128xf32>
    %181 = vector.multi_reduction <add>, %180, %cst_28 [0] : vector<32x128xf32> to vector<128xf32>
    %182 = vector.shape_cast %181 : vector<128xf32> to vector<1x128xf32>
    %183 = vector.extract_strided_slice %6 {offsets = [5, 0], sizes = [1, 128], strides = [1, 1]} : vector<8x128xf32> to vector<1x128xf32>
    %184 = arith.addf %183, %182 : vector<1x128xf32>
    %185 = arith.negf %184 : vector<1x128xf32>
    %186 = math.exp %185 : vector<1x128xf32>
    %cst_29 = arith.constant 1.000000e+00 : f32
    %187 = vector.broadcast %cst_29 : f32 to vector<1x128xf32>
    %188 = arith.addf %187, %186 : vector<1x128xf32>
    %189 = arith.divf %187, %188 : vector<1x128xf32>
    %190 = arith.mulf %189, %15 : vector<1x128xf32>
    %191 = arith.addf %190, %18 : vector<1x128xf32>
    %192 = vector.extract_strided_slice %191 {offsets = [0, 0], sizes = [1, 32], strides = [1, 1]} : vector<1x128xf32> to vector<1x32xf32>
    %193 = vector.extract_strided_slice %191 {offsets = [0, 32], sizes = [1, 32], strides = [1, 1]} : vector<1x128xf32> to vector<1x32xf32>
    %194 = vector.extract_strided_slice %191 {offsets = [0, 64], sizes = [1, 32], strides = [1, 1]} : vector<1x128xf32> to vector<1x32xf32>
    %195 = vector.extract_strided_slice %191 {offsets = [0, 96], sizes = [1, 32], strides = [1, 1]} : vector<1x128xf32> to vector<1x32xf32>
    %196 = arith.mulf %193, %167 : vector<1x32xf32>
    %197 = arith.mulf %192, %194 : vector<1x32xf32>
    %198 = arith.addf %196, %197 : vector<1x32xf32>
    %199 = math.tanh %198 : vector<1x32xf32>
    %200 = arith.mulf %195, %199 : vector<1x32xf32>
    %201 = vector.extract_strided_slice %30 {offsets = [0, 5], sizes = [8, 1], strides = [1, 1]} : vector<8x8xf32> to vector<8x1xf32>
    %202 = vector.broadcast %201 : vector<8x1xf32> to vector<8x32xf32>
    %203 = vector.broadcast %200 : vector<1x32xf32> to vector<8x32xf32>
    %204 = arith.mulf %202, %203 : vector<8x32xf32>
    %205 = arith.addf %174, %204 : vector<8x32xf32>
    %206 = vector.broadcast %200 : vector<1x32xf32> to vector<32x32xf32>
    %207 = arith.mulf %24, %206 : vector<32x32xf32>
    %cst_30 = arith.constant dense<0.000000e+00> : vector<32xf32>
    %208 = vector.multi_reduction <add>, %207, %cst_30 [1] : vector<32x32xf32> to vector<32xf32>
    %209 = vector.shape_cast %208 : vector<32xf32> to vector<32x1xf32>
    %210 = vector.broadcast %209 : vector<32x1xf32> to vector<32x128xf32>
    %211 = arith.mulf %210, %3 : vector<32x128xf32>
    %cst_31 = arith.constant dense<0.000000e+00> : vector<128xf32>
    %212 = vector.multi_reduction <add>, %211, %cst_31 [0] : vector<32x128xf32> to vector<128xf32>
    %213 = vector.shape_cast %212 : vector<128xf32> to vector<1x128xf32>
    %214 = vector.extract_strided_slice %6 {offsets = [6, 0], sizes = [1, 128], strides = [1, 1]} : vector<8x128xf32> to vector<1x128xf32>
    %215 = arith.addf %214, %213 : vector<1x128xf32>
    %216 = arith.negf %215 : vector<1x128xf32>
    %217 = math.exp %216 : vector<1x128xf32>
    %cst_32 = arith.constant 1.000000e+00 : f32
    %218 = vector.broadcast %cst_32 : f32 to vector<1x128xf32>
    %219 = arith.addf %218, %217 : vector<1x128xf32>
    %220 = arith.divf %218, %219 : vector<1x128xf32>
    %221 = arith.mulf %220, %15 : vector<1x128xf32>
    %222 = arith.addf %221, %18 : vector<1x128xf32>
    %223 = vector.extract_strided_slice %222 {offsets = [0, 0], sizes = [1, 32], strides = [1, 1]} : vector<1x128xf32> to vector<1x32xf32>
    %224 = vector.extract_strided_slice %222 {offsets = [0, 32], sizes = [1, 32], strides = [1, 1]} : vector<1x128xf32> to vector<1x32xf32>
    %225 = vector.extract_strided_slice %222 {offsets = [0, 64], sizes = [1, 32], strides = [1, 1]} : vector<1x128xf32> to vector<1x32xf32>
    %226 = vector.extract_strided_slice %222 {offsets = [0, 96], sizes = [1, 32], strides = [1, 1]} : vector<1x128xf32> to vector<1x32xf32>
    %227 = arith.mulf %224, %198 : vector<1x32xf32>
    %228 = arith.mulf %223, %225 : vector<1x32xf32>
    %229 = arith.addf %227, %228 : vector<1x32xf32>
    %230 = math.tanh %229 : vector<1x32xf32>
    %231 = arith.mulf %226, %230 : vector<1x32xf32>
    %232 = vector.extract_strided_slice %30 {offsets = [0, 6], sizes = [8, 1], strides = [1, 1]} : vector<8x8xf32> to vector<8x1xf32>
    %233 = vector.broadcast %232 : vector<8x1xf32> to vector<8x32xf32>
    %234 = vector.broadcast %231 : vector<1x32xf32> to vector<8x32xf32>
    %235 = arith.mulf %233, %234 : vector<8x32xf32>
    %236 = arith.addf %205, %235 : vector<8x32xf32>
    %237 = vector.broadcast %231 : vector<1x32xf32> to vector<32x32xf32>
    %238 = arith.mulf %24, %237 : vector<32x32xf32>
    %cst_33 = arith.constant dense<0.000000e+00> : vector<32xf32>
    %239 = vector.multi_reduction <add>, %238, %cst_33 [1] : vector<32x32xf32> to vector<32xf32>
    %240 = vector.shape_cast %239 : vector<32xf32> to vector<32x1xf32>
    %241 = vector.broadcast %240 : vector<32x1xf32> to vector<32x128xf32>
    %242 = arith.mulf %241, %3 : vector<32x128xf32>
    %cst_34 = arith.constant dense<0.000000e+00> : vector<128xf32>
    %243 = vector.multi_reduction <add>, %242, %cst_34 [0] : vector<32x128xf32> to vector<128xf32>
    %244 = vector.shape_cast %243 : vector<128xf32> to vector<1x128xf32>
    %245 = vector.extract_strided_slice %6 {offsets = [7, 0], sizes = [1, 128], strides = [1, 1]} : vector<8x128xf32> to vector<1x128xf32>
    %246 = arith.addf %245, %244 : vector<1x128xf32>
    %247 = arith.negf %246 : vector<1x128xf32>
    %248 = math.exp %247 : vector<1x128xf32>
    %cst_35 = arith.constant 1.000000e+00 : f32
    %249 = vector.broadcast %cst_35 : f32 to vector<1x128xf32>
    %250 = arith.addf %249, %248 : vector<1x128xf32>
    %251 = arith.divf %249, %250 : vector<1x128xf32>
    %252 = arith.mulf %251, %15 : vector<1x128xf32>
    %253 = arith.addf %252, %18 : vector<1x128xf32>
    %254 = vector.extract_strided_slice %253 {offsets = [0, 0], sizes = [1, 32], strides = [1, 1]} : vector<1x128xf32> to vector<1x32xf32>
    %255 = vector.extract_strided_slice %253 {offsets = [0, 32], sizes = [1, 32], strides = [1, 1]} : vector<1x128xf32> to vector<1x32xf32>
    %256 = vector.extract_strided_slice %253 {offsets = [0, 64], sizes = [1, 32], strides = [1, 1]} : vector<1x128xf32> to vector<1x32xf32>
    %257 = vector.extract_strided_slice %253 {offsets = [0, 96], sizes = [1, 32], strides = [1, 1]} : vector<1x128xf32> to vector<1x32xf32>
    %258 = arith.mulf %255, %229 : vector<1x32xf32>
    %259 = arith.mulf %254, %256 : vector<1x32xf32>
    %260 = arith.addf %258, %259 : vector<1x32xf32>
    %261 = math.tanh %260 : vector<1x32xf32>
    %262 = arith.mulf %257, %261 : vector<1x32xf32>
    %263 = vector.extract_strided_slice %30 {offsets = [0, 7], sizes = [8, 1], strides = [1, 1]} : vector<8x8xf32> to vector<8x1xf32>
    %264 = vector.broadcast %263 : vector<8x1xf32> to vector<8x32xf32>
    %265 = vector.broadcast %262 : vector<1x32xf32> to vector<8x32xf32>
    %266 = arith.mulf %264, %265 : vector<8x32xf32>
    %267 = arith.addf %236, %266 : vector<8x32xf32>
    tpu.wait_dma2 semaphore(%arg6 : memref<!tpu.dma_semaphore, #tpu.memory_space<semaphore_mem>>) src(%arg3 : memref<56x128xf32, #tpu.memory_space<any>>) dst(%arg5 : memref<56x128xf32, #tpu.memory_space<vmem>>)
    %c0_36 = arith.constant 0 : index
    %c0_37 = arith.constant 0 : index
    %268 = vector.load %arg5[%c0_36, %c0_37] : memref<56x128xf32, #tpu.memory_space<vmem>>, vector<32x128xf32>
    %c32 = arith.constant 32 : index
    %c0_38 = arith.constant 0 : index
    %269 = vector.load %arg5[%c32, %c0_38] : memref<56x128xf32, #tpu.memory_space<vmem>>, vector<16x128xf32>
    %c48 = arith.constant 48 : index
    %c0_39 = arith.constant 0 : index
    %270 = vector.load %arg5[%c48, %c0_39] : memref<56x128xf32, #tpu.memory_space<vmem>>, vector<1x128xf32>
    %cst_40 = arith.constant dense<0.000000e+00> : vector<8x128xf32>
    %271 = tpu.matmul %267, %268, %cst_40 {dimension_numbers = #tpu.dot_dimension_numbers<[1], [0], [0], [1], [0, 0, 1, 1], [], []>} : vector<8x32xf32>, vector<32x128xf32>, vector<8x128xf32> -> vector<8x128xf32>
    %cst_41 = arith.constant dense<0.000000e+00> : vector<8x128xf32>
    %272 = tpu.matmul %0, %269, %cst_41 {dimension_numbers = #tpu.dot_dimension_numbers<[1], [0], [0], [1], [0, 0, 1, 1], [], []>} : vector<8x16xf32>, vector<16x128xf32>, vector<8x128xf32> -> vector<8x128xf32>
    %273 = arith.addf %271, %272 : vector<8x128xf32>
    %274 = vector.broadcast %270 : vector<1x128xf32> to vector<8x128xf32>
    %275 = arith.addf %273, %274 : vector<8x128xf32>
    %276 = vector.extract_strided_slice %275 {offsets = [0, 0], sizes = [8, 8], strides = [1, 1]} : vector<8x128xf32> to vector<8x8xf32>
    %c0_42 = arith.constant 0 : index
    %c0_43 = arith.constant 0 : index
    %277 = vector.load %arg4[%c0_42, %c0_43] : memref<8x8xf32, #tpu.memory_space<vmem>>, vector<8x8xf32>
    tpu.vector_store %arg4[%c0_42, %c0_43], %276 {strides = array<i32>} : memref<8x8xf32, #tpu.memory_space<vmem>>, vector<8x8xf32>,
    return
  }
  func.func @transform_0(%arg0: i32) -> (i32, i32) {
    %c0_i32 = arith.constant 0 : i32
    %c0_i32_0 = arith.constant 0 : i32
    %c0_i32_1 = arith.constant 0 : i32
    return %c0_i32, %c0_i32_0 : i32, i32
  }
  func.func @transform_1(%arg0: i32) -> (i32, i32) {
    %c0_i32 = arith.constant 0 : i32
    %c0_i32_0 = arith.constant 0 : i32
    %c0_i32_1 = arith.constant 0 : i32
    return %c0_i32, %c0_i32_0 : i32, i32
  }
  func.func @transform_3(%arg0: i32) -> (i32, i32) {
    %c0_i32 = arith.constant 0 : i32
    %c0_i32_0 = arith.constant 0 : i32
    %c0_i32_1 = arith.constant 0 : i32
    return %c0_i32, %c0_i32_0 : i32, i32
  }
}

</mosaic_0001>

<bundles_post_ra>
// kernel: tpu_custom_call.1
= control target key start
LH: loop header
LB: loop body
LE: loop exit
PB: predicated region body
PF: predicated region fallthrough
CT: control target
= control target key end

     0   :  { %8 = vsyncpa [#allocation5], 0  ;;  %s1391_s0 = inlined_call_operand.hbm [shape: f32[8,16], index: 0, kind: input, shape index: {}]   ;;  %s1392_s1 = inlined_call_operand.hbm [shape: f32[56,128], index: 1, kind: input, shape index: {}]   ;;  %s1393_s2 = inlined_call_operand.hbm [shape: f32[56,128], index: 2, kind: input, shape index: {}]   ;;  %s1394_s3 = inlined_call_operand.hbm [shape: f32[8,8], index: 3, kind: output, shape index: {}]  }
   0x1   :  { %9 = vsyncpa [#allocation8], 0 }
   0x2   :  { %10 = vsyncpa [#allocation6], 0  ;;  %s1092_s12 = smov [#allocation4]   ;;  %s1093_s14 = smov [#allocation7]  }
   0x3   :  { %s17_s13 = sshll.u32 %s1092_s12, 4  ;;  %s26_s15 = sshll.u32 %s1093_s14, 4  ;;  %s18_s13 = int_to_ptr.vmem [resolvable:$true] %s17_s13  ;;  %s27_s15 = int_to_ptr.vmem [resolvable:$true] %s26_s15 }
   0x4   :  { %s1012_s16 = scalar_lea.vmem %s18_s13, 128  ;;  %p1017_p1 = scmp.lt.s32.totalorder %s18_s13, %s18_s13 }
   0x5   :  { %p1013_p0 = scmp.ne.s32.totalorder %s18_s13, %s1012_s16  ;;  %p1018_p2 = scmp.lt.s32.totalorder %s1012_s16, %s1012_s16 }
   0x7   :  { %p1019_p3 = por %p1018_p2, %p1017_p1 }
   0x9   :  { %p1020_p4 = pnand %p1019_p3, %p1013_p0 }
   0xb   :  { %1023 = shalt.err (!%p1020_p4)
}
   0xc   :  { %20 = dma.hbm_to_vmem [thread:$0]  %s1391_s0, 128, %s18_s13, [#allocation5]  }
   0xd   :  { %s1032_s19 = scalar_lea.vmem %s27_s15, 896  ;;  %p1037_p6 = scmp.lt.s32.totalorder %s27_s15, %s27_s15 }
   0xe   :  { %p1033_p5 = scmp.ne.s32.totalorder %s27_s15, %s1032_s19  ;;  %p1038_p7 = scmp.lt.s32.totalorder %s1032_s19, %s1032_s19 }
  0x10   :  { %p1039_p8 = por %p1038_p7, %p1037_p6 }
  0x12   :  { %p1040_p9 = pnand %p1039_p8, %p1033_p5 }
  0x14   :  { %1043 = shalt.err (!%p1040_p9)
}
  0x15   :  { %s1094_s20 = smov 128   ;;  %s1095_s21 = smov 8  }
  0x16   :  { %32 = dma.hbm_to_vmem [thread:$0]  %s1392_s1, 896, %s27_s15, [#allocation8], %s1094_s20, %s1094_s20, %s1095_s21  }
  0x17   :  { %1084 = dma.done.wait [#allocation5], 128  }
  0x18   :  { %1085 = vsyncadd [#allocation5], 4294967168 }
  0x19   :  { %1086 = dma.done.wait [#allocation8], 896  }
  0x1a   :  { %1087 = vsyncadd [#allocation8], 4294966400  ;;  %v1096_v0 = vmov 0.0   ;;  %vm1097_vm0 = vmmov 0   ;;  %v52_v1 = vld [vmem:[#allocation7 + $0x8] sm:$0xff]  ;;  %v51_v2 = vld [vmem:[#allocation7] sm:$0xff]  ;;  %v136_v10 = vlaneseq }
  0x1b   :  { %902 = vmatprep.subr.mxu1 %v1096_v0  ;;  %906 = vmatprep.mubr.msk.f32.mxu1 %vm1097_vm0, %v1096_v0  ;;  %v1141_v3 = vld [vmem:[#allocation4] sm:$0xff]  ;;  %vm62_vm1 = vcmask 130048   ;;  %v877_v4 = vld [vmem:[#allocation7 + $0x10] ss:$0 sm:$0xff]  ;;  %v1098_v13 = vmov 1.0   ;;  %s1099_s0 = smov 64  }
  0x1c   :  { %903 = vmatpush3.msra.mxu1 %v52_v1  ;;  %v137_v12 = vand.u32 127, %v136_v10  ;;  %s1100_s1 = smov 96   ;;  %v1157_v22 = vshrl.u32 %v136_v10, 7  ;;  %s1101_s24 = smov 32   ;;  %vm194_vm9 = vcmask 261120   ;;  %v1189_v44 = vld [vmem:[#allocation7 + $0x20] sm:$0xff] }
  0x1d   :  { %904 = vmatprep.subr.mxu1 %v1096_v0  ;;  %v1191_v45 = vld [vmem:[#allocation7 + $0x18] sm:$0xff]  ;;  %v1195_v50 = vld [vmem:[#allocation7 + $0x28] sm:$0xff]  ;;  %v1197_v52 = vld [vmem:[#allocation7 + $0x30] sm:$0xff]  ;;  %s1110_s25 = smov [#allocation2]  }
  0x1e   :  { %905 = vmatpush3.msra.mxu1 %v51_v2  ;;  %vm138_vm2 = vcmp.ge.s32.totalorder %v137_v12, 64  ;;  %vm139_vm3 = vcmp.lt.s32.totalorder %v137_v12, 96  ;;  %v182_v23 = vsub.s32 0, %v1157_v22  ;;  %v145_v27 = vadd.s32 8, %v1157_v22  ;;  %s46_s26 = sshll.u32 %s1110_s25, 4  ;;  %s47_s26 = int_to_ptr.vmem [resolvable:$true] %s46_s26 }
  0x1f   :  { %907 = vmatmul.mubr.msk.f32.vlgmr.msra.gmra.mxu1 %vm62_vm1, %v1141_v3  ;;  %vm140_vm4 = vmand %vm138_vm2, %vm139_vm3  ;;  %v146_v28 = vadd.s32 16, %v1157_v22  ;;  %v147_v29 = vadd.s32 24, %v1157_v22  ;;  %vm148_vm5 = vcmp.eq.s32.totalorder %v1157_v22, %v137_v12  ;;  %s1052_s27 = scalar_lea.vmem %s47_s26, 896  ;;  %p1057_p11 = scmp.lt.s32.totalorder %s47_s26, %s47_s26 }
  0x20   :  { %v1149_v14 = vsel %vm140_vm4, 2.0, %v1098_v13  ;;  %v1152_v16 = vsel %vm140_vm4, -1.0, %v1096_v0  ;;  %vm149_vm6 = vcmp.eq.s32.totalorder %v145_v27, %v137_v12  ;;  %v1169_v30 = vsel %vm148_vm5, 1.0, %v1096_v0  ;;  %p1053_p10 = scmp.ne.s32.totalorder %s47_s26, %s1052_s27  ;;  %p1058_p12 = scmp.lt.s32.totalorder %s1052_s27, %s1052_s27 }
  0x21   :  { %vm150_vm7 = vcmp.eq.s32.totalorder %v146_v28, %v137_v12  ;;  %vm151_vm8 = vcmp.eq.s32.totalorder %v147_v29, %v137_v12  ;;  %v1172_v31 = vsel %vm149_vm6, 1.0, %v1096_v0 }
  0x22   :  { %v1175_v33 = vsel %vm150_vm7, 1.0, %v1096_v0  ;;  %v1178_v34 = vsel %vm151_vm8, 1.0, %v1096_v0  ;;  %p1059_p13 = por %p1058_p12, %p1057_p11 }
  0x24   :  { %p1060_p0 = pnand %p1059_p13, %p1053_p10 }
  0xdf   :  { %v132_v5 = vpop.f32.mrf.mxu1 }
  0xe0   :  { %v1146_v6 = vadd.f32 %v877_v4, %v132_v5 }
  0xe1   :  { %v908_v7 = vpop.f32.mrf.mxu1 }
  0xe2   :  { %v879_v8 = vmul.f32 -1.442695, %v1146_v6 }
  0xe4   :  { %956 = vpow2.f32 %v879_v8 }
  0xf1   :  { %v957_v9 = vpop.eup %956 }
  0xf2   :  { %v159_v11 = vadd.f32 1.0, %v957_v9 }
  0xf4   :  { %958 = vrcp.f32 %v159_v11 }
 0x101   :  { %v959_v15 = vpop.eup %958 }
 0x102   :  { %v162_v17 = vmul.f32 %v959_v15, %v1149_v14 }
 0x104   :  { %v163_v18 = vadd.f32 %v162_v17, %v1152_v16 }
 0x106   :  { %165 = vrot.lane.b32.xlu0 %v163_v18, %s1099_s0 }
 0x178   :  { %v166_v19 = vpop.permute.xlu0 %165 }
 0x179   :  { %v168_v20 = vmul.f32 %v166_v19, %v163_v18 }
 0x17b   :  { %960 = vtanh.f32 %v168_v20  ;;  %v230_v43 = vrot.slane %v168_v20, 7  ;;  %v257_v20 = vsub.s32 1, %v1157_v22 }
 0x188   :  { %v961_v21 = vpop.eup %960 }
 0x189   :  { %171 = vrot.lane.b32.xlu0 %v961_v21, %s1100_s1 }
 0x1fb   :  { %v172_v24 = vpop.permute.xlu0 %171 }
 0x1fc   :  { %v174_v25 = vmul.f32 %v172_v24, %v163_v18 }
 0x1fe   :  { %v1160_v26 = vrot.slane %v174_v25, %v182_v23 }
 0x200   :  { %187 = vrot.lane.b32.xlu1 %v1160_v26, %s1101_s24 }
 0x272   :  { %v188_v32 = vpop.permute.xlu1 %187 }
 0x273   :  { %v191_v35 = vmul.f32 %v188_v32, %v1172_v31  ;;  %v190_v36 = vmul.f32 %v188_v32, %v1169_v30  ;;  %v192_v39 = vmul.f32 %v188_v32, %v1175_v33  ;;  %v193_v40 = vmul.f32 %v188_v32, %v1178_v34 }
 0x275   :  { %v198_v37 = vsel %vm194_vm9, %v191_v35, 0.0  ;;  %v195_v38 = vsel %vm194_vm9, %v190_v36, 0.0  ;;  %v201_v41 = vsel %vm194_vm9, %v192_v39, 0.0  ;;  %v204_v42 = vsel %vm194_vm9, %v193_v40, 0.0 }
 0x276   :  { %199 = vadd.xlane.f32.xlu0 %v198_v37  ;;  %196 = vadd.xlane.f32.xlu1 %v195_v38 }
 0x27a   :  { %202 = vadd.xlane.f32.xlu0 %v201_v41  ;;  %205 = vadd.xlane.f32.xlu1 %v204_v42 }
 0x28b   :  { %231 = vrot.lane.b32.xlu1 %v230_v43, %s1101_s24 }
 0x2ff   :  { %v200_v46 = vpop.xlane.xlu0 %199  ;;  %v197_v47 = vpop.xlane.xlu1 %196 }
 0x300   :  { %v208_v48 = vmul.f32 %v200_v46, %v1189_v44  ;;  %v207_v49 = vmul.f32 %v197_v47, %v1191_v45 }
 0x302   :  { %v211_v54 = vadd.f32 %v208_v48, %v207_v49 }
 0x303   :  { %v203_v51 = vpop.xlane.xlu0 %202  ;;  %v206_v53 = vpop.xlane.xlu1 %205 }
 0x304   :  { %v209_v55 = vmul.f32 %v203_v51, %v1195_v50  ;;  %v210_v57 = vmul.f32 %v206_v53, %v1197_v52 }
 0x306   :  { %v212_v56 = vadd.f32 %v211_v54, %v209_v55 }
 0x307   :  { %v232_v13 = vpop.permute.xlu1 %231 }
 0x308   :  { %v213_v58 = vadd.f32 %v212_v56, %v210_v57 }
 0x30a   :  { %v214_v59 = vrot.slane %v213_v58, 4 }
 0x30c   :  { %v215_v60 = vadd.f32 %v214_v59, %v213_v58 }
 0x30e   :  { %v216_v61 = vrot.slane %v215_v60, 2 }
 0x310   :  { %v217_v62 = vadd.f32 %v216_v61, %v215_v60 }
 0x312   :  { %v218_v63 = vrot.slane %v217_v62, 1 }
 0x314   :  { %v219_v1 = vadd.f32 %v218_v63, %v217_v62 }
 0x316   :  { %v220_v2 = vadd.f32 %v219_v1, %v1146_v6 }
 0x318   :  { %v880_v4 = vmul.f32 -1.442695, %v220_v2 }
 0x31a   :  { %962 = vpow2.f32 %v880_v4 }
 0x327   :  { %v963_v5 = vpop.eup %962 }
 0x328   :  { %v224_v7 = vadd.f32 1.0, %v963_v5 }
 0x32a   :  { %964 = vrcp.f32 %v224_v7 }
 0x337   :  { %v965_v8 = vpop.eup %964 }
 0x338   :  { %v227_v9 = vmul.f32 %v965_v8, %v1149_v14 }
 0x33a   :  { %v228_v10 = vadd.f32 %v227_v9, %v1152_v16 }
 0x33c   :  { %236 = vrot.lane.b32.xlu0 %v228_v10, %s1099_s0  ;;  %v234_v15 = vmul.f32 %v232_v13, %v228_v10  ;;  %v329_v13 = vsub.s32 2, %v1157_v22 }
 0x3ae   :  { %v237_v11 = vpop.permute.xlu0 %236 }
 0x3af   :  { %v239_v12 = vmul.f32 %v237_v11, %v228_v10 }
 0x3b1   :  { %241 = vrot.lane.b32.xlu1 %v239_v12, %s1101_s24 }
 0x423   :  { %v242_v17 = vpop.permute.xlu1 %241 }
 0x424   :  { %v244_v18 = vadd.f32 %v242_v17, %v234_v15 }
 0x426   :  { %966 = vtanh.f32 %v244_v18  ;;  %v304_v8 = vrot.slane %v244_v18, 7 }
 0x433   :  { %v967_v19 = vpop.eup %966 }
 0x434   :  { %247 = vrot.lane.b32.xlu0 %v967_v19, %s1099_s0 }
 0x4a6   :  { %v248_v21 = vpop.permute.xlu0 %247 }
 0x4a7   :  { %v250_v23 = vmul.f32 %v248_v21, %v228_v10 }
 0x4a9   :  { %v1208_v24 = vrot.slane %v250_v23, %v257_v20 }
 0x4ab   :  { %262 = vrot.lane.b32.xlu1 %v1208_v24, %s1101_s24 }
 0x51d   :  { %v263_v25 = vpop.permute.xlu1 %262 }
 0x51e   :  { %v266_v27 = vmul.f32 %v263_v25, %v1172_v31  ;;  %v265_v28 = vmul.f32 %v263_v25, %v1169_v30  ;;  %v267_v35 = vmul.f32 %v263_v25, %v1175_v33  ;;  %v268_v37 = vmul.f32 %v263_v25, %v1178_v34 }
 0x520   :  { %v272_v29 = vsel %vm194_vm9, %v266_v27, 0.0  ;;  %v269_v32 = vsel %vm194_vm9, %v265_v28, 0.0  ;;  %v275_v36 = vsel %vm194_vm9, %v267_v35, 0.0  ;;  %v278_v38 = vsel %vm194_vm9, %v268_v37, 0.0 }
 0x521   :  { %273 = vadd.xlane.f32.xlu1 %v272_v29  ;;  %270 = vadd.xlane.f32.xlu0 %v269_v32 }
 0x525   :  { %276 = vadd.xlane.f32.xlu0 %v275_v36 }
 0x529   :  { %279 = vadd.xlane.f32.xlu0 %v278_v38 }
 0x5aa   :  { %v274_v39 = vpop.xlane.xlu1 %273  ;;  %v271_v40 = vpop.xlane.xlu0 %270 }
 0x5ab   :  { %v282_v41 = vmul.f32 %v274_v39, %v1189_v44  ;;  %v281_v42 = vmul.f32 %v271_v40, %v1191_v45 }
 0x5ad   :  { %v285_v47 = vadd.f32 %v282_v41, %v281_v42 }
 0x5ae   :  { %v277_v43 = vpop.xlane.xlu0 %276 }
 0x5af   :  { %v283_v46 = vmul.f32 %v277_v43, %v1195_v50 }
 0x5b1   :  { %v286_v49 = vadd.f32 %v285_v47, %v283_v46 }
 0x5b2   :  { %v280_v48 = vpop.xlane.xlu0 %279 }
 0x5b3   :  { %v284_v51 = vmul.f32 %v280_v48, %v1197_v52 }
 0x5b5   :  { %v287_v53 = vadd.f32 %v286_v49, %v284_v51 }
 0x5b7   :  { %v288_v54 = vrot.slane %v287_v53, 4 }
 0x5b9   :  { %v289_v55 = vadd.f32 %v288_v54, %v287_v53 }
 0x5bb   :  { %v290_v56 = vrot.slane %v289_v55, 2 }
 0x5bd   :  { %v291_v57 = vadd.f32 %v290_v56, %v289_v55 }
 0x5bf   :  { %v292_v58 = vrot.slane %v291_v57, 1 }
 0x5c1   :  { %v293_v59 = vadd.f32 %v292_v58, %v291_v57 }
 0x5c3   :  { %v294_v60 = vadd.f32 %v293_v59, %v1146_v6 }
 0x5c5   :  { %v881_v61 = vmul.f32 -1.442695, %v294_v60 }
 0x5c7   :  { %968 = vpow2.f32 %v881_v61 }
 0x5d4   :  { %v969_v62 = vpop.eup %968 }
 0x5d5   :  { %v298_v63 = vadd.f32 1.0, %v969_v62 }
 0x5d7   :  { %970 = vrcp.f32 %v298_v63 }
 0x5e4   :  { %v971_v1 = vpop.eup %970 }
 0x5e5   :  { %v301_v2 = vmul.f32 %v971_v1, %v1149_v14 }
 0x5e7   :  { %v302_v4 = vadd.f32 %v301_v2, %v1152_v16 }
 0x5e9   :  { %308 = vrot.lane.b32.xlu1 %v302_v4, %s1099_s0  ;;  %v306_v9 = vmul.f32 %v304_v8, %v302_v4 }
 0x65b   :  { %v309_v5 = vpop.permute.xlu1 %308 }
 0x65c   :  { %v311_v7 = vmul.f32 %v309_v5, %v302_v4 }
 0x65e   :  { %313 = vrot.lane.b32.xlu0 %v311_v7, %s1101_s24 }
 0x6d0   :  { %v314_v10 = vpop.permute.xlu0 %313 }
 0x6d1   :  { %v316_v11 = vadd.f32 %v314_v10, %v306_v9  ;;  %v401_v9 = vsub.s32 3, %v1157_v22 }
 0x6d3   :  { %972 = vtanh.f32 %v316_v11  ;;  %v376_v2 = vrot.slane %v316_v11, 7 }
 0x6e0   :  { %v973_v12 = vpop.eup %972 }
 0x6e1   :  { %319 = vrot.lane.b32.xlu1 %v973_v12, %s1099_s0 }
 0x753   :  { %v320_v15 = vpop.permute.xlu1 %319 }
 0x754   :  { %v322_v17 = vmul.f32 %v320_v15, %v302_v4 }
 0x756   :  { %v1231_v19 = vrot.slane %v322_v17, %v329_v13 }
 0x758   :  { %334 = vrot.lane.b32.xlu1 %v1231_v19, %s1101_s24 }
 0x7ca   :  { %v335_v20 = vpop.permute.xlu1 %334 }
 0x7cb   :  { %v338_v21 = vmul.f32 %v335_v20, %v1172_v31  ;;  %v337_v18 = vmul.f32 %v335_v20, %v1169_v30  ;;  %v339_v27 = vmul.f32 %v335_v20, %v1175_v33  ;;  %v340_v29 = vmul.f32 %v335_v20, %v1178_v34 }
 0x7cd   :  { %v344_v23 = vsel %vm194_vm9, %v338_v21, 0.0  ;;  %v341_v25 = vsel %vm194_vm9, %v337_v18, 0.0  ;;  %v347_v28 = vsel %vm194_vm9, %v339_v27, 0.0  ;;  %v350_v32 = vsel %vm194_vm9, %v340_v29, 0.0 }
 0x7ce   :  { %345 = vadd.xlane.f32.xlu1 %v344_v23  ;;  %342 = vadd.xlane.f32.xlu0 %v341_v25 }
 0x7d2   :  { %348 = vadd.xlane.f32.xlu0 %v347_v28 }
 0x7d6   :  { %351 = vadd.xlane.f32.xlu0 %v350_v32 }
 0x857   :  { %v346_v35 = vpop.xlane.xlu1 %345  ;;  %v343_v36 = vpop.xlane.xlu0 %342 }
 0x858   :  { %v354_v37 = vmul.f32 %v346_v35, %v1189_v44  ;;  %v353_v38 = vmul.f32 %v343_v36, %v1191_v45 }
 0x85a   :  { %v357_v41 = vadd.f32 %v354_v37, %v353_v38 }
 0x85b   :  { %v349_v39 = vpop.xlane.xlu0 %348 }
 0x85c   :  { %v355_v40 = vmul.f32 %v349_v39, %v1195_v50 }
 0x85e   :  { %v358_v43 = vadd.f32 %v357_v41, %v355_v40 }
 0x85f   :  { %v352_v42 = vpop.xlane.xlu0 %351 }
 0x860   :  { %v356_v46 = vmul.f32 %v352_v42, %v1197_v52 }
 0x862   :  { %v359_v47 = vadd.f32 %v358_v43, %v356_v46 }
 0x864   :  { %v360_v48 = vrot.slane %v359_v47, 4 }
 0x866   :  { %v361_v49 = vadd.f32 %v360_v48, %v359_v47 }
 0x868   :  { %v362_v51 = vrot.slane %v361_v49, 2 }
 0x86a   :  { %v363_v53 = vadd.f32 %v362_v51, %v361_v49 }
 0x86c   :  { %v364_v54 = vrot.slane %v363_v53, 1 }
 0x86e   :  { %v365_v55 = vadd.f32 %v364_v54, %v363_v53 }
 0x870   :  { %v366_v56 = vadd.f32 %v365_v55, %v1146_v6 }
 0x872   :  { %v882_v57 = vmul.f32 -1.442695, %v366_v56 }
 0x874   :  { %974 = vpow2.f32 %v882_v57 }
 0x881   :  { %v975_v58 = vpop.eup %974 }
 0x882   :  { %v370_v59 = vadd.f32 1.0, %v975_v58 }
 0x884   :  { %976 = vrcp.f32 %v370_v59 }
 0x891   :  { %v977_v60 = vpop.eup %976 }
 0x892   :  { %v373_v61 = vmul.f32 %v977_v60, %v1149_v14 }
 0x894   :  { %v374_v62 = vadd.f32 %v373_v61, %v1152_v16 }
 0x896   :  { %380 = vrot.lane.b32.xlu1 %v374_v62, %s1099_s0  ;;  %v378_v4 = vmul.f32 %v376_v2, %v374_v62 }
 0x908   :  { %v381_v63 = vpop.permute.xlu1 %380 }
 0x909   :  { %v383_v1 = vmul.f32 %v381_v63, %v374_v62 }
 0x90b   :  { %385 = vrot.lane.b32.xlu0 %v383_v1, %s1101_s24 }
 0x97d   :  { %v386_v5 = vpop.permute.xlu0 %385 }
 0x97e   :  { %v388_v7 = vadd.f32 %v386_v5, %v378_v4  ;;  %v473_v5 = vsub.s32 4, %v1157_v22 }
 0x980   :  { %978 = vtanh.f32 %v388_v7 }
 0x98d   :  { %v979_v8 = vpop.eup %978 }
 0x98e   :  { %391 = vrot.lane.b32.xlu1 %v979_v8, %s1099_s0 }
 0xa00   :  { %v392_v10 = vpop.permute.xlu1 %391 }
 0xa01   :  { %v394_v12 = vmul.f32 %v392_v10, %v374_v62  ;;  %v448_v62 = vrot.slane %v388_v7, 7 }
 0xa03   :  { %v1254_v13 = vrot.slane %v394_v12, %v401_v9 }
 0xa05   :  { %406 = vrot.lane.b32.xlu1 %v1254_v13, %s1101_s24 }
 0xa77   :  { %v407_v15 = vpop.permute.xlu1 %406 }
 0xa78   :  { %v410_v17 = vmul.f32 %v407_v15, %v1172_v31  ;;  %v409_v11 = vmul.f32 %v407_v15, %v1169_v30  ;;  %v411_v18 = vmul.f32 %v407_v15, %v1175_v33  ;;  %v412_v25 = vmul.f32 %v407_v15, %v1178_v34 }
 0xa7a   :  { %v416_v20 = vsel %vm194_vm9, %v410_v17, 0.0  ;;  %v413_v21 = vsel %vm194_vm9, %v409_v11, 0.0  ;;  %v419_v23 = vsel %vm194_vm9, %v411_v18, 0.0  ;;  %v422_v27 = vsel %vm194_vm9, %v412_v25, 0.0 }
 0xa7b   :  { %417 = vadd.xlane.f32.xlu1 %v416_v20  ;;  %414 = vadd.xlane.f32.xlu0 %v413_v21 }
 0xa7f   :  { %420 = vadd.xlane.f32.xlu0 %v419_v23 }
 0xa83   :  { %423 = vadd.xlane.f32.xlu0 %v422_v27 }
 0xb04   :  { %v418_v28 = vpop.xlane.xlu1 %417  ;;  %v415_v29 = vpop.xlane.xlu0 %414 }
 0xb05   :  { %v426_v32 = vmul.f32 %v418_v28, %v1189_v44  ;;  %v425_v35 = vmul.f32 %v415_v29, %v1191_v45 }
 0xb07   :  { %v429_v38 = vadd.f32 %v426_v32, %v425_v35 }
 0xb08   :  { %v421_v36 = vpop.xlane.xlu0 %420 }
 0xb09   :  { %v427_v37 = vmul.f32 %v421_v36, %v1195_v50 }
 0xb0b   :  { %v430_v40 = vadd.f32 %v429_v38, %v427_v37 }
 0xb0c   :  { %v424_v39 = vpop.xlane.xlu0 %423 }
 0xb0d   :  { %v428_v41 = vmul.f32 %v424_v39, %v1197_v52 }
 0xb0f   :  { %v431_v42 = vadd.f32 %v430_v40, %v428_v41 }
 0xb11   :  { %v432_v43 = vrot.slane %v431_v42, 4 }
 0xb13   :  { %v433_v46 = vadd.f32 %v432_v43, %v431_v42 }
 0xb15   :  { %v434_v47 = vrot.slane %v433_v46, 2 }
 0xb17   :  { %v435_v48 = vadd.f32 %v434_v47, %v433_v46 }
 0xb19   :  { %v436_v49 = vrot.slane %v435_v48, 1 }
 0xb1b   :  { %v437_v51 = vadd.f32 %v436_v49, %v435_v48 }
 0xb1d   :  { %v438_v53 = vadd.f32 %v437_v51, %v1146_v6 }
 0xb1f   :  { %v883_v54 = vmul.f32 -1.442695, %v438_v53 }
 0xb21   :  { %980 = vpow2.f32 %v883_v54 }
 0xb2e   :  { %v981_v55 = vpop.eup %980 }
 0xb2f   :  { %v442_v56 = vadd.f32 1.0, %v981_v55 }
 0xb31   :  { %982 = vrcp.f32 %v442_v56 }
 0xb3e   :  { %v983_v57 = vpop.eup %982 }
 0xb3f   :  { %v445_v58 = vmul.f32 %v983_v57, %v1149_v14 }
 0xb41   :  { %v446_v59 = vadd.f32 %v445_v58, %v1152_v16 }
 0xb43   :  { %452 = vrot.lane.b32.xlu1 %v446_v59, %s1099_s0  ;;  %v450_v63 = vmul.f32 %v448_v62, %v446_v59 }
 0xbb5   :  { %v453_v60 = vpop.permute.xlu1 %452 }
 0xbb6   :  { %v455_v61 = vmul.f32 %v453_v60, %v446_v59 }
 0xbb8   :  { %457 = vrot.lane.b32.xlu0 %v455_v61, %s1101_s24 }
 0xc2a   :  { %v458_v1 = vpop.permute.xlu0 %457 }
 0xc2b   :  { %v460_v2 = vadd.f32 %v458_v1, %v450_v63 }
 0xc2d   :  { %984 = vtanh.f32 %v460_v2  ;;  %v520_v60 = vrot.slane %v460_v2, 7 }
 0xc3a   :  { %v985_v4 = vpop.eup %984 }
 0xc3b   :  { %463 = vrot.lane.b32.xlu1 %v985_v4, %s1099_s0  ;;  %v545_v4 = vsub.s32 5, %v1157_v22 }
 0xcad   :  { %v464_v8 = vpop.permute.xlu1 %463 }
 0xcae   :  { %v466_v9 = vmul.f32 %v464_v8, %v446_v59 }
 0xcb0   :  { %v1277_v10 = vrot.slane %v466_v9, %v473_v5 }
 0xcb2   :  { %478 = vrot.lane.b32.xlu1 %v1277_v10, %s1101_s24 }
 0xd24   :  { %v479_v12 = vpop.permute.xlu1 %478 }
 0xd25   :  { %v482_v15 = vmul.f32 %v479_v12, %v1172_v31  ;;  %v481_v7 = vmul.f32 %v479_v12, %v1169_v30  ;;  %v483_v20 = vmul.f32 %v479_v12, %v1175_v33  ;;  %v484_v18 = vmul.f32 %v479_v12, %v1178_v34 }
 0xd27   :  { %v488_v17 = vsel %vm194_vm9, %v482_v15, 0.0  ;;  %v485_v11 = vsel %vm194_vm9, %v481_v7, 0.0  ;;  %v491_v21 = vsel %vm194_vm9, %v483_v20, 0.0  ;;  %v494_v23 = vsel %vm194_vm9, %v484_v18, 0.0 }
 0xd28   :  { %489 = vadd.xlane.f32.xlu1 %v488_v17  ;;  %486 = vadd.xlane.f32.xlu0 %v485_v11 }
 0xd2c   :  { %492 = vadd.xlane.f32.xlu0 %v491_v21 }
 0xd30   :  { %495 = vadd.xlane.f32.xlu0 %v494_v23 }
 0xdb1   :  { %v490_v25 = vpop.xlane.xlu1 %489  ;;  %v487_v27 = vpop.xlane.xlu0 %486 }
 0xdb2   :  { %v498_v28 = vmul.f32 %v490_v25, %v1189_v44  ;;  %v497_v29 = vmul.f32 %v487_v27, %v1191_v45 }
 0xdb4   :  { %v501_v36 = vadd.f32 %v498_v28, %v497_v29 }
 0xdb5   :  { %v493_v32 = vpop.xlane.xlu0 %492 }
 0xdb6   :  { %v499_v35 = vmul.f32 %v493_v32, %v1195_v50 }
 0xdb8   :  { %v502_v38 = vadd.f32 %v501_v36, %v499_v35 }
 0xdb9   :  { %v496_v37 = vpop.xlane.xlu0 %495 }
 0xdba   :  { %v500_v39 = vmul.f32 %v496_v37, %v1197_v52 }
 0xdbc   :  { %v503_v40 = vadd.f32 %v502_v38, %v500_v39 }
 0xdbe   :  { %v504_v41 = vrot.slane %v503_v40, 4 }
 0xdc0   :  { %v505_v42 = vadd.f32 %v504_v41, %v503_v40 }
 0xdc2   :  { %v506_v43 = vrot.slane %v505_v42, 2 }
 0xdc4   :  { %v507_v46 = vadd.f32 %v506_v43, %v505_v42 }
 0xdc6   :  { %v508_v47 = vrot.slane %v507_v46, 1 }
 0xdc8   :  { %v509_v48 = vadd.f32 %v508_v47, %v507_v46 }
 0xdca   :  { %v510_v49 = vadd.f32 %v509_v48, %v1146_v6 }
 0xdcc   :  { %v884_v51 = vmul.f32 -1.442695, %v510_v49 }
 0xdce   :  { %986 = vpow2.f32 %v884_v51 }
 0xddb   :  { %v987_v53 = vpop.eup %986 }
 0xddc   :  { %v514_v54 = vadd.f32 1.0, %v987_v53 }
 0xdde   :  { %988 = vrcp.f32 %v514_v54 }
 0xdeb   :  { %v989_v55 = vpop.eup %988 }
 0xdec   :  { %v517_v56 = vmul.f32 %v989_v55, %v1149_v14 }
 0xdee   :  { %v518_v57 = vadd.f32 %v517_v56, %v1152_v16 }
 0xdf0   :  { %524 = vrot.lane.b32.xlu1 %v518_v57, %s1099_s0  ;;  %v522_v61 = vmul.f32 %v520_v60, %v518_v57 }
 0xe62   :  { %v525_v58 = vpop.permute.xlu1 %524 }
 0xe63   :  { %v527_v59 = vmul.f32 %v525_v58, %v518_v57 }
 0xe65   :  { %529 = vrot.lane.b32.xlu0 %v527_v59, %s1101_s24 }
 0xed7   :  { %v530_v62 = vpop.permute.xlu0 %529 }
 0xed8   :  { %v532_v63 = vadd.f32 %v530_v62, %v522_v61 }
 0xeda   :  { %990 = vtanh.f32 %v532_v63  ;;  %v592_v59 = vrot.slane %v532_v63, 7 }
 0xee7   :  { %v991_v1 = vpop.eup %990 }
 0xee8   :  { %535 = vrot.lane.b32.xlu1 %v991_v1, %s1099_s0 }
 0xf5a   :  { %v536_v5 = vpop.permute.xlu1 %535 }
 0xf5b   :  { %v538_v8 = vmul.f32 %v536_v5, %v518_v57 }
 0xf5d   :  { %v1300_v9 = vrot.slane %v538_v8, %v545_v4  ;;  %v617_v4 = vsub.s32 6, %v1157_v22 }
 0xf5f   :  { %550 = vrot.lane.b32.xlu1 %v1300_v9, %s1101_s24 }
 0xfd1   :  { %v551_v12 = vpop.permute.xlu1 %550 }
 0xfd2   :  { %v554_v15 = vmul.f32 %v551_v12, %v1172_v31  ;;  %v553_v2 = vmul.f32 %v551_v12, %v1169_v30  ;;  %v555_v11 = vmul.f32 %v551_v12, %v1175_v33  ;;  %v556_v21 = vmul.f32 %v551_v12, %v1178_v34 }
 0xfd4   :  { %v560_v7 = vsel %vm194_vm9, %v554_v15, 0.0  ;;  %v557_v17 = vsel %vm194_vm9, %v553_v2, 0.0  ;;  %v563_v20 = vsel %vm194_vm9, %v555_v11, 0.0  ;;  %v566_v18 = vsel %vm194_vm9, %v556_v21, 0.0 }
 0xfd5   :  { %561 = vadd.xlane.f32.xlu1 %v560_v7  ;;  %558 = vadd.xlane.f32.xlu0 %v557_v17 }
 0xfd9   :  { %564 = vadd.xlane.f32.xlu0 %v563_v20 }
 0xfdd   :  { %567 = vadd.xlane.f32.xlu0 %v566_v18 }
0x105e   :  { %v562_v23 = vpop.xlane.xlu1 %561  ;;  %v559_v25 = vpop.xlane.xlu0 %558 }
0x105f   :  { %v570_v27 = vmul.f32 %v562_v23, %v1189_v44  ;;  %v569_v28 = vmul.f32 %v559_v25, %v1191_v45  ;;  %v1102_v23 = vmov 0  }
0x1060   :  { %947 = vset.pattern.permute.xlu1 %v1102_v23 }
0x1061   :  { %v573_v35 = vadd.f32 %v570_v27, %v569_v28 }
0x1062   :  { %v565_v29 = vpop.xlane.xlu0 %564 }
0x1063   :  { %v571_v32 = vmul.f32 %v565_v29, %v1195_v50 }
0x1065   :  { %v574_v37 = vadd.f32 %v573_v35, %v571_v32 }
0x1066   :  { %v568_v36 = vpop.xlane.xlu0 %567 }
0x1067   :  { %v572_v38 = vmul.f32 %v568_v36, %v1197_v52 }
0x1069   :  { %v575_v39 = vadd.f32 %v574_v37, %v572_v38 }
0x106b   :  { %v576_v40 = vrot.slane %v575_v39, 4 }
0x106d   :  { %v577_v41 = vadd.f32 %v576_v40, %v575_v39 }
0x106f   :  { %v578_v42 = vrot.slane %v577_v41, 2 }
0x1071   :  { %v579_v43 = vadd.f32 %v578_v42, %v577_v41 }
0x1073   :  { %v580_v46 = vrot.slane %v579_v43, 1 }
0x1075   :  { %v581_v47 = vadd.f32 %v580_v46, %v579_v43 }
0x1077   :  { %v582_v48 = vadd.f32 %v581_v47, %v1146_v6 }
0x1079   :  { %v885_v49 = vmul.f32 -1.442695, %v582_v48 }
0x107b   :  { %992 = vpow2.f32 %v885_v49 }
0x1088   :  { %v993_v51 = vpop.eup %992 }
0x1089   :  { %v586_v53 = vadd.f32 1.0, %v993_v51  ;;  %v1104_v51 = vmov 1  }
0x108b   :  { %994 = vrcp.f32 %v586_v53  ;;  %v1106_v53 = vmov 4  }
0x1098   :  { %v995_v54 = vpop.eup %994 }
0x1099   :  { %v589_v55 = vmul.f32 %v995_v54, %v1149_v14 }
0x109b   :  { %v590_v56 = vadd.f32 %v589_v55, %v1152_v16 }
0x109d   :  { %596 = vrot.lane.b32.xlu1 %v590_v56, %s1099_s0  ;;  %v594_v60 = vmul.f32 %v592_v59, %v590_v56 }
0x110f   :  { %v597_v57 = vpop.permute.xlu1 %596 }
0x1110   :  { %v599_v58 = vmul.f32 %v597_v57, %v590_v56 }
0x1112   :  { %601 = vrot.lane.b32.xlu0 %v599_v58, %s1101_s24 }
0x1184   :  { %v602_v61 = vpop.permute.xlu0 %601 }
0x1185   :  { %v1321_v62 = vadd.f32 %v602_v61, %v594_v60 }
0x1187   :  { %996 = vtanh.f32 %v1321_v62  ;;  %v664_v57 = vrot.slane %v1321_v62, 7 }
0x1194   :  { %v997_v1 = vpop.eup %996 }
0x1195   :  { %607 = vrot.lane.b32.xlu1 %v997_v1, %s1099_s0 }
0x1207   :  { %v608_v5 = vpop.permute.xlu1 %607 }
0x1208   :  { %v610_v8 = vmul.f32 %v608_v5, %v590_v56  ;;  %v1109_v56 = vmov 5  }
0x120a   :  { %v1326_v12 = vrot.slane %v610_v8, %v617_v4 }
0x120c   :  { %622 = vrot.lane.b32.xlu1 %v1326_v12, %s1101_s24 }
0x127e   :  { %v623_v15 = vpop.permute.xlu1 %622 }
0x127f   :  { %v626_v63 = vmul.f32 %v623_v15, %v1172_v31  ;;  %v625_v2 = vmul.f32 %v623_v15, %v1169_v30  ;;  %v627_v11 = vmul.f32 %v623_v15, %v1175_v33  ;;  %v628_v21 = vmul.f32 %v623_v15, %v1178_v34 }
0x1281   :  { %v632_v7 = vsel %vm194_vm9, %v626_v63, 0.0  ;;  %v629_v17 = vsel %vm194_vm9, %v625_v2, 0.0  ;;  %v635_v20 = vsel %vm194_vm9, %v627_v11, 0.0  ;;  %v638_v18 = vsel %vm194_vm9, %v628_v21, 0.0 }
0x1282   :  { %633 = vadd.xlane.f32.xlu1 %v632_v7  ;;  %630 = vadd.xlane.f32.xlu0 %v629_v17 }
0x1286   :  { %636 = vadd.xlane.f32.xlu0 %v635_v20 }
0x128a   :  { %639 = vadd.xlane.f32.xlu0 %v638_v18 }
0x130b   :  { %v634_v31 = vpop.xlane.xlu1 %633  ;;  %v631_v25 = vpop.xlane.xlu0 %630 }
0x130c   :  { %v642_v27 = vmul.f32 %v634_v31, %v1189_v44  ;;  %v641_v28 = vmul.f32 %v631_v25, %v1191_v45 }
0x130e   :  { %v645_v32 = vadd.f32 %v642_v27, %v641_v28 }
0x130f   :  { %v637_v29 = vpop.xlane.xlu0 %636 }
0x1310   :  { %v643_v33 = vmul.f32 %v637_v29, %v1195_v50  ;;  %v1103_v50 = vmov 2  }
0x1311   :  { %949 = vset.pattern.permute.xlu0 %v1103_v50 }
0x1312   :  { %v646_v36 = vadd.f32 %v645_v32, %v643_v33 }
0x1313   :  { %v640_v35 = vpop.xlane.xlu0 %639 }
0x1314   :  { %v644_v34 = vmul.f32 %v640_v35, %v1197_v52 }
0x1316   :  { %v647_v37 = vadd.f32 %v646_v36, %v644_v34 }
0x1318   :  { %v648_v38 = vrot.slane %v647_v37, 4 }
0x131a   :  { %v649_v39 = vadd.f32 %v648_v38, %v647_v37 }
0x131c   :  { %v650_v40 = vrot.slane %v649_v39, 2 }
0x131e   :  { %v651_v41 = vadd.f32 %v650_v40, %v649_v39 }
0x1320   :  { %v652_v42 = vrot.slane %v651_v41, 1 }
0x1322   :  { %v653_v43 = vadd.f32 %v652_v42, %v651_v41 }
0x1324   :  { %v654_v46 = vadd.f32 %v653_v43, %v1146_v6  ;;  %v1105_v6 = vmov 3  }
0x1326   :  { %v886_v44 = vmul.f32 -1.442695, %v654_v46 }
0x1328   :  { %998 = vpow2.f32 %v886_v44 }
0x1335   :  { %v999_v45 = vpop.eup %998 }
0x1336   :  { %v658_v47 = vadd.f32 1.0, %v999_v45 }
0x1338   :  { %1000 = vrcp.f32 %v658_v47 }
0x1345   :  { %v1001_v48 = vpop.eup %1000 }
0x1346   :  { %v661_v49 = vmul.f32 %v1001_v48, %v1149_v14  ;;  %v1107_v14 = vmov 6  }
0x1348   :  { %v1345_v52 = vadd.f32 %v661_v49, %v1152_v16  ;;  %v1108_v16 = vmov 7  }
0x134a   :  { %668 = vrot.lane.b32.xlu1 %v1345_v52, %s1099_s0  ;;  %v666_v58 = vmul.f32 %v664_v57, %v1345_v52 }
0x134e   :  { %177 = vperm.xlu1 %947, %v1169_v30  }
0x1352   :  { %948 = vset.pattern.permute.xlu1 %v1104_v51 }
0x1353   :  { %252 = vperm.xlu1 %948, %v1169_v30  }
0x1357   :  { %950 = vset.pattern.permute.xlu1 %v1105_v6 }
0x1358   :  { %396 = vperm.xlu1 %950, %v1169_v30  }
0x135c   :  { %951 = vset.pattern.permute.xlu1 %v1106_v53 }
0x135d   :  { %468 = vperm.xlu1 %951, %v1169_v30  }
0x1361   :  { %953 = vset.pattern.permute.xlu1 %v1107_v14 }
0x1362   :  { %612 = vperm.xlu1 %953, %v1169_v30  }
0x1366   :  { %954 = vset.pattern.permute.xlu1 %v1108_v16 }
0x1367   :  { %684 = vperm.xlu1 %954, %v1169_v30  }
0x13bc   :  { %v669_v54 = vpop.permute.xlu1 %668 }
0x13bd   :  { %v671_v55 = vmul.f32 %v669_v54, %v1345_v52 }
0x13bf   :  { %673 = vrot.lane.b32.xlu0 %v671_v55, %s1101_s24 }
0x13c3   :  { %324 = vperm.xlu0 %949, %v1169_v30  }
0x13c7   :  { %952 = vset.pattern.permute.xlu0 %v1109_v56 }
0x13c8   :  { %540 = vperm.xlu0 %952, %v1169_v30  }
0x13cc   :  { %955 = vset.pattern.permute.xlu0 %v1108_v16 }
0x1431   :  { %v674_v59 = vpop.permute.xlu0 %673 }
0x1432   :  { %v676_v60 = vadd.f32 %v674_v59, %v666_v58 }
0x1434   :  { %1002 = vtanh.f32 %v676_v60 }
0x1435   :  { %1063 = shalt.err (!%p1060_p0)  }
0x1436   :  { %49 = dma.hbm_to_vmem [thread:$0]  %s1393_s2, 896, %s47_s26, [#allocation3]  ;;  %v178_v61 = vpop.permute.xlu1 %177 }
0x1437   :  { %v184_v5 = vmul.f32 %v1160_v26, %v178_v61 }
0x143a   :  { %v253_v62 = vpop.permute.xlu1 %252 }
0x143b   :  { %v259_v4 = vmul.f32 %v1208_v24, %v253_v62  ;;  %v689_v24 = vsub.s32 7, %v1157_v22 }
0x143d   :  { %v260_v63 = vadd.f32 %v259_v4, %v184_v5 }
0x143e   :  { %v325_v1 = vpop.permute.xlu0 %324  ;;  %v397_v15 = vpop.permute.xlu1 %396 }
0x143f   :  { %v331_v8 = vmul.f32 %v1231_v19, %v325_v1  ;;  %v403_v7 = vmul.f32 %v1254_v13, %v397_v15 }
0x1441   :  { %v1003_v30 = vpop.eup %1002  ;;  %v332_v2 = vadd.f32 %v331_v8, %v260_v63 }
0x1442   :  { %679 = vrot.lane.b32.xlu0 %v1003_v30, %s1099_s0  ;;  %v469_v17 = vpop.permute.xlu1 %468 }
0x1443   :  { %v404_v11 = vadd.f32 %v403_v7, %v332_v2  ;;  %v541_v20 = vpop.permute.xlu0 %540  ;;  %v475_v21 = vmul.f32 %v1277_v10, %v469_v17 }
0x1444   :  { %v547_v23 = vmul.f32 %v1300_v9, %v541_v20 }
0x1445   :  { %v476_v18 = vadd.f32 %v475_v21, %v404_v11 }
0x1446   :  { %v613_v31 = vpop.permute.xlu1 %612 }
0x1447   :  { %v548_v26 = vadd.f32 %v547_v23, %v476_v18  ;;  %v619_v28 = vmul.f32 %v1326_v12, %v613_v31 }
0x1449   :  { %v620_v13 = vadd.f32 %v619_v28, %v548_v26 }
0x144a   :  { %v685_v27 = vpop.permute.xlu1 %684 }
0x14b4   :  { %v680_v25 = vpop.permute.xlu0 %679 }
0x14b5   :  { %v682_v19 = vmul.f32 %v680_v25, %v1345_v52 }
0x14b7   :  { %v690_v29 = vrot.slane %v682_v19, %v689_v24 }
0x14b9   :  { %v691_v33 = vmul.f32 %v690_v29, %v685_v27 }
0x14bb   :  { %v692_v32 = vadd.f32 %v691_v33, %v620_v13 }
0x14bd   :  { %774 = vrot.lane.b32.xlu0 %v692_v32, %s1101_s24 }
0x14be   :  { %1088 = dma.done.wait [#allocation3], 896 }
0x14bf   :  { %1089 = vsyncadd [#allocation3], 4294966400  ;;  %916 = vmatprep.subr.mxu0 %v1096_v0  ;;  %909 = vmatprep.subr.mxu1 %v1096_v0  ;;  %v699_v22 = vld [vmem:[#allocation2 + $0x18] sm:$0xff]  ;;  %v701_v10 = vld [vmem:[#allocation2 + $0x28] sm:$0xff]  ;;  %s1111_s2 = smov [#allocation9]   ;;  %vm853_vm10 = vcmask 64512  }
0x14c0   :  { %913 = vmatprep.mubr.msk.f32.mxu1 %vm1097_vm0, %v1096_v0  ;;  %924 = vmatprep.mubr.msk.f32.mxu0 %vm1097_vm0, %v1096_v0  ;;  %v698_v9 = vld [vmem:[#allocation2 + $0x10] sm:$0xff]  ;;  %v700_v12 = vld [vmem:[#allocation2 + $0x20] sm:$0xff]  ;;  %v697_v35 = vld [vmem:[#allocation2 + $0x8] sm:$0xff]  ;;  %s861_s30 = sshll.u32 %s1111_s2, 4  ;;  %s862_s30 = int_to_ptr.vmem [resolvable:$true] %s861_s30 }
0x14c1   :  { %917 = vmatpush3.msra.mxu0 %v699_v22  ;;  %910 = vmatpush3.msra.mxu1 %v701_v10  ;;  %v696_v36 = vld [vmem:[#allocation2] sm:$0xff]  ;;  %v889_v39 = vld [vmem:[#allocation2 + $0x30] ss:$0 sm:$0xff]  ;;  %s1064_s4 = scalar_lea.vmem %s862_s30, 128  ;;  %p1069_p2 = scmp.lt.s32.totalorder %s862_s30, %s862_s30 }
0x14c2   :  { %918 = vmatprep.subr.mxu0 %v1096_v0  ;;  %911 = vmatprep.subr.mxu1 %v1096_v0  ;;  %p1065_p1 = scmp.ne.s32.totalorder %s862_s30, %s1064_s4  ;;  %p1070_p3 = scmp.lt.s32.totalorder %s1064_s4, %s1064_s4 }
0x14c3   :  { %919 = vmatpush3.msra.mxu0 %v698_v9  ;;  %912 = vmatpush3.msra.mxu1 %v700_v12 }
0x14c4   :  { %920 = vmatprep.subr.mxu0 %v1096_v0  ;;  %914 = vmatmul.mubr.msk.f32.vlgmr.msra.gmra.mxu1 %vm62_vm1, %v1141_v3  ;;  %p1071_p4 = por %p1070_p3, %p1069_p2 }
0x14c5   :  { %921 = vmatpush3.msra.mxu0 %v697_v35 }
0x14c6   :  { %922 = vmatprep.subr.mxu0 %v1096_v0  ;;  %p1072_p5 = pnand %p1071_p4, %p1065_p1 }
0x14c7   :  { %923 = vmatpush3.msra.mxu0 %v696_v36 }
0x152f   :  { %v775_v34 = vpop.permute.xlu0 %774 }
0x1530   :  { %925 = vmatmul.mubr.msk.f32.vlgmr.msra.gmra.mxu0 %vm194_vm9, %v775_v34 }
0x1584   :  { %v769_v37 = vpop.f32.mrf.mxu1 }
0x1586   :  { %v915_v38 = vpop.f32.mrf.mxu1 }
0x15f0   :  { %v844_v40 = vpop.f32.mrf.mxu0 }
0x15f1   :  { %v845_v41 = vadd.f32 %v844_v40, %v769_v37 }
0x15f2   :  { %v926_v42 = vpop.f32.mrf.mxu0 }
0x15f3   :  { %v852_v43 = vadd.f32 %v889_v39, %v845_v41 }
0x15f5   :  { %854 = vst.msk [vmem:[#allocation9] sm:$0xff] %vm853_vm10, %v852_v43 }
0x15f6   :  { %1075 = shalt.err (!%p1072_p5)
}
0x15f7   :  { %864 = dma.vmem_to_hbm [thread:$0]  %s862_s30, 128, %s1394_s3, [#allocation6]  }
0x15f8   :  { %1090 = dma.done.wait [#allocation6], 128  }
0x15f9   :  { %1091 = vsyncadd [#allocation6], 4294967168 }
0x15fa   :  { %868 = vsyncpa [#allocation5], 1 }
0x15fb   :  { %869 = vsyncpa [#allocation8], 1 }
0x15fc   :  { %870 = vsyncpa [#allocation6], 1 }
0x15fd   :  { %871 = vsyncmov [#allocation3] }
0x1600   :  { %s872_s7 = vpop.sfrf %871 }
0x1601   :  { %p890_p6 = scmp.ne.s32.totalorder %s872_s7, 0 }
0x1603   :  { %876 = shalt.err (%p890_p6)  }

</bundles_post_ra>
